<compile_context>
chip_gen: v7x
topology: tpu7x:2x2x1
jax: 0.10.0
libtpu: 0.0.40
codegen_flags: <defaults>
</compile_context>

<pallas_src>
import functools

import jax
import jax.numpy as jnp
from jax.experimental import pallas as pl
from jax.experimental.pallas import tpu as pltpu

PCLOUD_KERNEL = (8, 4, 1)                                            # picasso self.pcloud_kernel
KBINS = PCLOUD_KERNEL[0] * PCLOUD_KERNEL[1] * PCLOUD_KERNEL[2] + 1   # +1 = self bin
FACTOR = 4
LANE = 128
VMEM_LIMIT = 48 * 1024 * 1024   # explicit, with headroom under v7x's 64 MiB physical


def _round_up(v, m=LANE):
    return ((v + m - 1) // m) * m


def _row_tile(m, cap=256):
    """Row tile: multiple of 8, capped at 256 (v7x 64 MiB VMEM re-derivation), and
    <= ceil(m/2) so the 'parallel' grid axis has >=2 programs (keeps both v7x TCs busy)."""
    half = (((m + 1) // 2) + 7) // 8 * 8
    return max(8, min(half, cap))


def _k_tile(k, cap=512):
    """Reduction tile: full extent when small, else the largest 128-multiple <= cap
    that divides k exactly (partial blocks must never feed an accumulation)."""
    if k <= cap:
        return k
    t = (cap // LANE) * LANE
    while t >= LANE:
        if k % t == 0:
            return t
        t -= LANE
    return k


def _cparams(*sem):
    return pltpu.CompilerParams(dimension_semantics=sem, vmem_limit_bytes=VMEM_LIMIT)


# ----------------------------------------------------------------------------
# Pallas kernels
# ----------------------------------------------------------------------------
def _linear_kernel(x_ref, w_ref, shift_ref, o_ref, *, apply_relu):
    # y = x @ (W * bn_scale) + shift   (BN scale pre-folded into W in glue)
    y = jnp.dot(x_ref[...], w_ref[...], preferred_element_type=jnp.float32)
    y = y + shift_ref[...]
    if apply_relu:
        y = jnp.maximum(y, 0.0)
    o_ref[...] = y.astype(o_ref.dtype)


def linear_act(x, w, shift, apply_relu=True, out_dtype=jnp.bfloat16):
    """PerItemConv3d: fused matmul + folded-BN shift + ReLU, row-tiled, lane-dense out."""
    m, k = x.shape
    n = w.shape[1]
    tm = _row_tile(m)
    return pl.pallas_call(
        functools.partial(_linear_kernel, apply_relu=apply_relu),
        out_shape=jax.ShapeDtypeStruct((m, n), out_dtype),
        grid=(pl.cdiv(m, tm),),
        in_specs=[
            pl.BlockSpec((tm, k), lambda i: (i, 0)),
            pl.BlockSpec((k, n), lambda i: (0, 0)),
            pl.BlockSpec((1, n), lambda i: (0, 0)),
        ],
        out_specs=pl.BlockSpec((tm, n), lambda i: (i, 0)),
        compiler_params=_cparams("parallel"),
    )(x, w, shift)


def _facet_weight_kernel(xcat_ref, coeff_ref, w_ref, shift_ref, wdw_ref, o_ref):
    # V2F: facet = relu(cat(corners) @ W_v2f + shift), then fuzzy mesh-kernel
    # weighting facet * (coeff @ W_dw), computed once per face-row tile.
    facet = jnp.dot(xcat_ref[...], w_ref[...], preferred_element_type=jnp.float32)
    facet = jnp.maximum(facet + shift_ref[...], 0.0)
    cw = jnp.dot(coeff_ref[...], wdw_ref[...], preferred_element_type=jnp.float32)
    o_ref[...] = (facet * cw).astype(o_ref.dtype)


def facet_weighted(xcat, coeff, w, shift, f2v_dw):
    nf, kc = xcat.shape
    mk = coeff.shape[1]
    c1p = w.shape[1]
    tm = _row_tile(nf)
    return pl.pallas_call(
        _facet_weight_kernel,
        out_shape=jax.ShapeDtypeStruct((nf, c1p), jnp.bfloat16),
        grid=(pl.cdiv(nf, tm),),
        in_specs=[
            pl.BlockSpec((tm, kc), lambda i: (i, 0)),
            pl.BlockSpec((tm, mk), lambda i: (i, 0)),
            pl.BlockSpec((kc, c1p), lambda i: (0, 0)),
            pl.BlockSpec((1, c1p), lambda i: (0, 0)),
            pl.BlockSpec((mk, c1p), lambda i: (0, 0)),
        ],
        out_specs=pl.BlockSpec((tm, c1p), lambda i: (i, 0)),
        compiler_params=_cparams("parallel"),
    )(xcat, coeff, w, shift, f2v_dw)


def _f2v_pw_kernel(inc_ref, wfac_ref, w_ref, shift_ref, o_ref, vdw_acc):
    # F2V aggregation as a K-reduction over face tiles (VMEM f32 accumulator),
    # pointwise+BN+ReLU epilogue only on the last reduction step.
    f = pl.program_id(1)

    @pl.when(f == 0)
    def _():
        vdw_acc[...] = jnp.zeros_like(vdw_acc)

    vdw_acc[...] += jnp.dot(inc_ref[...], wfac_ref[...],
                            preferred_element_type=jnp.float32)

    @pl.when(f == pl.num_programs(1) - 1)
    def _():
        y = jnp.dot(vdw_acc[...].astype(jnp.bfloat16), w_ref[...],
                    preferred_element_type=jnp.float32)
        o_ref[...] = jnp.maximum(y + shift_ref[...], 0.0).astype(o_ref.dtype)


def f2v_pointwise(inc_norm, weighted, w, shift):
    nv, nf = inc_norm.shape
    c1p = weighted.shape[1]
    c2p = w.shape[1]
    tm = _row_tile(nv)
    tf = _k_tile(nf)
    nf_tiles = max(1, nf // tf)
    flops = 2 * nv * nf * c1p + 2 * nv * c1p * c2p
    bytes_accessed = 2 * (nv * nf + nf * c1p + c1p * c2p + nv * c2p)
    return pl.pallas_call(
        _f2v_pw_kernel,
        out_shape=jax.ShapeDtypeStruct((nv, c2p), jnp.bfloat16),
        grid=(pl.cdiv(nv, tm), nf_tiles),
        in_specs=[
            pl.BlockSpec((tm, tf), lambda i, f: (i, f)),
            pl.BlockSpec((tf, c1p), lambda i, f: (f, 0)),
            pl.BlockSpec((c1p, c2p), lambda i, f: (0, 0)),
            pl.BlockSpec((1, c2p), lambda i, f: (0, 0)),
        ],
        out_specs=pl.BlockSpec((tm, c2p), lambda i, f: (i, 0)),
        scratch_shapes=[pltpu.VMEM((tm, c1p), jnp.float32)],
        compiler_params=_cparams("parallel", "arbitrary"),
        cost_estimate=pl.CostEstimate(flops=flops, transcendentals=0,
                                      bytes_accessed=bytes_accessed),
    )(inc_norm, weighted, w, shift)


def _dual_tail_kernel(x_ref, ex_ref, inc_ref, w2_ref, wm_ref, sm_ref,
                      adj_ref, p1_ref, dw_ref, wp_ref, sp_ref, o_ref,
                      vdw_acc, pdw_acc, *, nf_tiles):
    # One combined reduction axis r: face tiles [0, nf_tiles) feed the mesh-branch
    # F2V accumulator, bin steps [nf_tiles, nf_tiles+KBINS) feed the point-branch
    # spherical depthwise accumulator ((adj_k @ p1) * dw[k]).  Wide pointwise convs,
    # ReLU, passthrough embedding and the [x, Mnet, Pnet] concat-as-sum all happen
    # once in the final-step epilogue -> a single lane-dense store, no live wide f32
    # temporaries during the reduction.
    r = pl.program_id(1)

    @pl.when(r == 0)
    def _():
        vdw_acc[...] = jnp.zeros_like(vdw_acc)
        pdw_acc[...] = jnp.zeros_like(pdw_acc)

    @pl.when(r < nf_tiles)                                   # mesh F2V step
    def _():
        vdw_acc[...] += jnp.dot(inc_ref[...], w2_ref[...],
                                preferred_element_type=jnp.float32)

    @pl.when(r >= nf_tiles)                                  # spherical-bin step
    def _():
        pdw_acc[...] += jnp.dot(adj_ref[0], p1_ref[...],
                                preferred_element_type=jnp.float32) * dw_ref[0]

    @pl.when(r == pl.num_programs(1) - 1)                    # fused epilogue
    def _():
        mnet = jnp.dot(vdw_acc[...].astype(jnp.bfloat16), wm_ref[...],
                       preferred_element_type=jnp.float32)
        pnet = jnp.dot(pdw_acc[...].astype(jnp.bfloat16), wp_ref[...],
                       preferred_element_type=jnp.float32)
        xemb = jnp.dot(x_ref[...], ex_ref[...], preferred_element_type=jnp.float32)
        # wm/sm and wp/sp occupy disjoint column slices (zeros elsewhere), so a single
        # ReLU over the sum equals per-branch ReLUs; xemb is the un-activated passthrough.
        y = xemb + jnp.maximum(mnet + pnet + sm_ref[...] + sp_ref[...], 0.0)
        o_ref[...] = y.astype(o_ref.dtype)


def dual_tail(x, ex, inc_norm, weighted2, wm, sm, adj, p1, dw, wp, sp):
    nv, cp_pad = x.shape
    nf = inc_norm.shape[1]
    c1p = weighted2.shape[1]
    c_out_pad = ex.shape[1]
    kbins = adj.shape[0]
    tm = _row_tile(nv)
    tf = _k_tile(nf)
    nf_tiles = max(1, nf // tf)
    nred = nf_tiles + kbins
    # TODO(synk): adjacency is still dense O(KBINS*N^2); realistic N needs an
    #             nnz-proportional scalar-prefetch / DMA-gather path.
    flops = (2 * nv * nf * c1p + 2 * kbins * nv * nv * c1p
             + 4 * nv * c1p * c_out_pad + 2 * nv * cp_pad * c_out_pad)
    bytes_accessed = 2 * (nv * cp_pad + cp_pad * c_out_pad + nv * nf + nf * c1p
                          + kbins * nv * nv + nv * c1p + 2 * c1p * c_out_pad
                          + nv * c_out_pad)
    kern = functools.partial(_dual_tail_kernel, nf_tiles=nf_tiles)
    return pl.pallas_call(
        kern,
        out_shape=jax.ShapeDtypeStruct((nv, c_out_pad), jnp.bfloat16),
        grid=(pl.cdiv(nv, tm), nred),
        in_specs=[
            pl.BlockSpec((tm, cp_pad), lambda i, r: (i, 0)),                            # x
            pl.BlockSpec((cp_pad, c_out_pad), lambda i, r: (0, 0)),                     # ex
            pl.BlockSpec((tm, tf),
                         lambda i, r: (i, jnp.minimum(r, nf_tiles - 1))),               # inc
            pl.BlockSpec((tf, c1p),
                         lambda i, r: (jnp.minimum(r, nf_tiles - 1), 0)),               # w2
            pl.BlockSpec((c1p, c_out_pad), lambda i, r: (0, 0)),                        # wm
            pl.BlockSpec((1, c_out_pad), lambda i, r: (0, 0)),                          # sm
            pl.BlockSpec((1, tm, nv),
                         lambda i, r: (jnp.maximum(r - nf_tiles, 0), i, 0)),            # adj
            pl.BlockSpec((nv, c1p), lambda i, r: (0, 0)),                               # p1
            pl.BlockSpec((1, 1, c1p),
                         lambda i, r: (jnp.maximum(r - nf_tiles, 0), 0, 0)),            # dw
            pl.BlockSpec((c1p, c_out_pad), lambda i, r: (0, 0)),                        # wp
            pl.BlockSpec((1, c_out_pad), lambda i, r: (0, 0)),                          # sp
        ],
        out_specs=pl.BlockSpec((tm, c_out_pad), lambda i, r: (i, 0)),
        scratch_shapes=[pltpu.VMEM((tm, c1p), jnp.float32),
                        pltpu.VMEM((tm, c1p), jnp.float32)],
        compiler_params=_cparams("parallel", "arbitrary"),
        cost_estimate=pl.CostEstimate(flops=flops, transcendentals=0,
                                      bytes_accessed=bytes_accessed),
    )(x, ex, inc_norm, weighted2, wm, sm, adj, p1, dw, wp, sp)


# ----------------------------------------------------------------------------
# Glue: graph / incidence construction (data-dependent preprocessing, built once)
# ----------------------------------------------------------------------------
def build_point_graph(xyz, radius, max_nn, pcloud_kernel=PCLOUD_KERNEL):
    """Per-bin neighbor adjacency (KBINS, N, N) bf16 for the spherical kernel.
    Replaces pointUtil.build_range_graph (nn_cnt, nn_idx, filt_idx, filt_coeff)."""
    # TODO(synk): fuzzy (soft) bin interpolation of build_range_graph is approximated
    #             with hard binning (coefficient 1.0 per neighbor).
    n = xyz.shape[0]
    n_azi, n_pol, n_rad = pcloud_kernel
    kbins = n_azi * n_pol * n_rad + 1
    diff = xyz[None, :, :] - xyz[:, None, :]            # diff[q, p] = xyz[p] - xyz[q]
    dist = jnp.sqrt(jnp.sum(diff * diff, axis=-1) + 1e-12)
    eye = jnp.eye(n, dtype=bool)
    neigh = (dist < radius) & (~eye)
    if max_nn is not None:                              # keep max_nn nearest in-radius
        masked = jnp.where(neigh, dist, jnp.inf)
        order = jnp.argsort(masked, axis=-1)
        rank = jnp.argsort(order, axis=-1)
        neigh = neigh & (rank < max_nn)
    nn_cnt = jnp.sum(neigh, axis=-1) + 1                # include self
    inv_cnt = 1.0 / jnp.maximum(nn_cnt.astype(jnp.float32), 1.0)

    azi = jnp.arctan2(diff[..., 1], diff[..., 0])
    pol = jnp.arccos(jnp.clip(diff[..., 2] / dist, -1.0, 1.0))
    azi_bin = jnp.clip(jnp.floor((azi + jnp.pi) / (2.0 * jnp.pi) * n_azi), 0, n_azi - 1)
    pol_bin = jnp.clip(jnp.floor(pol / jnp.pi * n_pol), 0, n_pol - 1)
    rad_bin = jnp.clip(jnp.floor(dist / radius * n_rad), 0, n_rad - 1)
    bins = (azi_bin * n_pol * n_rad + pol_bin * n_rad + rad_bin).astype(jnp.int32)

    # built directly per-bin (no f32 one-hot / transpose chain), cast once to bf16
    kidx = jnp.arange(kbins - 1, dtype=jnp.int32)[:, None, None]
    adj = jnp.where((bins[None] == kidx) & neigh[None],
                    inv_cnt[None, :, None], 0.0)                        # (kbins-1, n, n)
    self_adj = jnp.diag(inv_cnt)[None]                                  # (1, n, n)
    return jnp.concatenate([adj, self_adj], axis=0).astype(jnp.bfloat16)


def build_mesh_incidence(face, nf_count, num_vertices):
    """Normalized dense vertex<-face incidence (Nv, Nf) used for the F2V scatter."""
    # TODO(synk): picasso's full_vt_map CSR scatter path is replaced by this dense
    #             incidence matmul; full_vt_map itself is therefore unused.
    onehot = jax.nn.one_hot(face, num_vertices, dtype=jnp.float32)      # (Nf, 3, Nv)
    inc = jnp.sum(onehot, axis=1).T                                     # (Nv, Nf)
    denom = jnp.maximum(nf_count.astype(jnp.float32), 1.0)
    return (inc / denom[:, None]).astype(jnp.bfloat16)


# ----------------------------------------------------------------------------
# Parameters (deterministic synthetic init; BN folded, bf16 operands, 128-lane pads)
# ----------------------------------------------------------------------------
def _bn_fold(b, cout, eps=1e-5):
    gamma = jnp.ones((cout,), jnp.float32)
    beta = jnp.zeros((cout,), jnp.float32)
    mean = jnp.zeros((cout,), jnp.float32)
    var = jnp.ones((cout,), jnp.float32)
    scale = gamma / jnp.sqrt(var + eps)
    shift = beta + (b - mean) * scale
    return scale, shift


def _embed(w, rows, cols):
    r, c = w.shape
    return jnp.pad(w, ((0, rows - r), (0, cols - c)))


def _dense_params(key, cin_real, cin_pad, cout_real, cout_pad):
    kw, kb = jax.random.split(key)
    w = jax.random.normal(kw, (cin_real, cout_real), jnp.float32) * 0.1
    b = jax.random.normal(kb, (cout_real,), jnp.float32) * 0.01
    scale, shift = _bn_fold(b, cout_real)
    w = w * scale[None, :]                                   # BN scale folded
    return {"w": _embed(w, cin_pad, cout_pad).astype(jnp.bfloat16),
            "shift": _embed(shift.reshape(1, cout_real), 1, cout_pad)}   # f32 shift


def _v2v_params(key, cin_real, cin_pad, c1_real, c2_real, mesh_k):
    c1_pad = _round_up(c1_real)
    k1, k2, k3, k4, k5, k6 = jax.random.split(key, 6)
    v2f_dw = jax.random.normal(k1, (3, cin_real), jnp.float32) * 0.1
    w_pw1 = jax.random.normal(k2, (cin_real, c1_real), jnp.float32) * 0.1
    b1 = jax.random.normal(k3, (c1_real,), jnp.float32) * 0.01
    scale1, shift1 = _bn_fold(b1, c1_real)
    # exact fold: 3-corner depthwise x pointwise x BN scale -> one (3*cin_pad, c1_pad)
    wcomb = (v2f_dw[:, :, None] * w_pw1[None, :, :]) * scale1[None, None, :]
    wcomb_pad = jnp.zeros((3, cin_pad, c1_pad), jnp.float32)
    wcomb_pad = wcomb_pad.at[:, :cin_real, :c1_real].set(wcomb)
    wcomb_pad = wcomb_pad.reshape(3 * cin_pad, c1_pad).astype(jnp.bfloat16)
    f2v_dw = _embed(jax.random.normal(k4, (mesh_k, c1_real), jnp.float32) * 0.1,
                    mesh_k, c1_pad).astype(jnp.bfloat16)
    w_pw2 = jax.random.normal(k5, (c1_real, c2_real), jnp.float32) * 0.1
    b2 = jax.random.normal(k6, (c2_real,), jnp.float32) * 0.01
    scale2, shift2 = _bn_fold(b2, c2_real)
    return {"v2f_w": wcomb_pad,
            "v2f_shift": _embed(shift1.reshape(1, c1_real), 1, c1_pad),
            "f2v_dw": f2v_dw,
            "pw_w": w_pw2 * scale2[None, :],                 # real, placed by caller
            "pw_shift": shift2.reshape(1, c2_real)}


def _pcloud_params(key, c1_real, c1_pad, c2_real, kbins):
    k1, k2, k3 = jax.random.split(key, 3)
    dw = jax.random.normal(k1, (kbins, c1_real), jnp.float32) * 0.1
    dw_pad = jnp.zeros((kbins, 1, c1_pad), jnp.float32).at[:, 0, :c1_real].set(dw)
    pw_w = jax.random.normal(k2, (c1_real, c2_real), jnp.float32) * 0.1
    b = jax.random.normal(k3, (c2_real,), jnp.float32) * 0.01
    scale, shift = _bn_fold(b, c2_real)
    return {"dw": dw_pad,                                    # f32 (KBINS, 1, C1p)
            "pw_w": pw_w * scale[None, :], "pw_shift": shift.reshape(1, c2_real)}


def init_dualblock_params(key, in_channels, out_channels, growth_rate,
                          mesh_kernel_size, max_iter):
    iters = []
    cp_real, cp_pad = in_channels, _round_up(in_channels)
    c1 = FACTOR * growth_rate
    c1_pad = _round_up(c1)
    c2 = 2 * growth_rate
    keys = jax.random.split(key, max_iter + 1)
    for n in range(max_iter):
        k1, k2, k3, k4 = jax.random.split(keys[n], 4)
        mesh1 = _v2v_params(k1, cp_real, cp_pad, c1, c1, mesh_kernel_size)
        mesh2 = _v2v_params(k2, c1, c1_pad, c1, c2, mesh_kernel_size)
        dense = _dense_params(k3, cp_real, cp_pad, c1, c1_pad)
        pcl = _pcloud_params(k4, c1, c1_pad, c2, KBINS)
        c_out_real = cp_real + 2 * c2
        c_out_pad = _round_up(c_out_real)
        # mesh1's trailing pointwise, padded to a lane-dense 128-wide output
        m1w = jnp.zeros((c1_pad, c1_pad), jnp.float32).at[:c1, :c1].set(mesh1.pop("pw_w"))
        m1s = jnp.zeros((1, c1_pad), jnp.float32).at[:, :c1].set(mesh1.pop("pw_shift"))
        mesh1["f2v_pw_w"] = m1w.astype(jnp.bfloat16)
        mesh1["f2v_pw_shift"] = m1s
        # fused tail: zero-widened pointwise weights + identity embedding -> the
        # concat [x, Mnet, Pnet] becomes a plain sum, stored lane-dense (c_out_pad).
        ex = jnp.zeros((cp_pad, c_out_pad), jnp.float32)
        ex = ex.at[:cp_real, :cp_real].set(jnp.eye(cp_real, dtype=jnp.float32))
        wm = jnp.zeros((c1_pad, c_out_pad), jnp.float32)
        wm = wm.at[:c1, cp_real:cp_real + c2].set(mesh2.pop("pw_w"))
        sm = jnp.zeros((1, c_out_pad), jnp.float32)
        sm = sm.at[:, cp_real:cp_real + c2].set(mesh2.pop("pw_shift"))
        wp = jnp.zeros((c1_pad, c_out_pad), jnp.float32)
        wp = wp.at[:c1, cp_real + c2:cp_real + 2 * c2].set(pcl.pop("pw_w"))
        sp = jnp.zeros((1, c_out_pad), jnp.float32)
        sp = sp.at[:, cp_real + c2:cp_real + 2 * c2].set(pcl.pop("pw_shift"))
        tail = {"ex": ex.astype(jnp.bfloat16), "wm": wm.astype(jnp.bfloat16), "sm": sm,
                "wp": wp.astype(jnp.bfloat16), "sp": sp}
        iters.append({"mesh1": mesh1, "mesh2": mesh2, "dense": dense, "pcloud": pcl,
                      "tail": tail,
                      "dims": {"cp_real": cp_real, "cp_pad": cp_pad,
                               "c_out_real": c_out_real, "c_out_pad": c_out_pad}})
        cp_real, cp_pad = c_out_real, c_out_pad
    transit = _dense_params(keys[max_iter], cp_real, cp_pad,
                            out_channels, _round_up(out_channels))
    return {"iters": iters, "transit": transit, "out_channels": out_channels}


# ----------------------------------------------------------------------------
# Module forward
# ----------------------------------------------------------------------------
def v2f_stage(x_pad, face, coeff, p):
    """V2VConv3d first half: corner gather + fused V2F conv + fuzzy weighting."""
    # TODO(synk): corner gather stays as XLA glue; an in-kernel scalar-prefetch row
    #             gather would need per-face pl.Element blocks (1 face per grid step).
    nf = face.shape[0]
    cpad = x_pad.shape[1]
    xcat = x_pad[face].reshape(nf, 3 * cpad)                 # (Nf, 3*Cp_pad)
    return facet_weighted(xcat, coeff, p["v2f_w"], p["v2f_shift"], p["f2v_dw"])


def dual_block_forward(params, inputs, vertex, face, full_nf_count, full_vt_map,
                       filt_coeff, nv_in, *, radius, max_nn, max_iter):
    del full_vt_map                      # see TODO in build_mesh_incidence
    # TODO(synk): nv_in (per-sample vertex counts of a packed batch) is unused; the
    #             demo runs one packed sample so the graph never crosses samples.
    del nv_in
    xyz = vertex[:, :3]
    n_pts = inputs.shape[0]
    adj = build_point_graph(xyz, radius=radius, max_nn=max_nn)        # (KBINS, N, N)
    inc_norm = build_mesh_incidence(face, full_nf_count, n_pts)       # (Nv, Nf)
    coeff = filt_coeff.astype(jnp.bfloat16)

    cin = inputs.shape[1]
    cp_pad0 = params["iters"][0]["dims"]["cp_pad"]
    x = jnp.pad(inputs, ((0, 0), (0, cp_pad0 - cin))).astype(jnp.bfloat16)
    for n in range(max_iter):
        it = params["iters"][n]
        # ---- mesh branch ------------------------------------------------------
        w1 = v2f_stage(x, face, coeff, it["mesh1"])                    # (Nf, C1p)
        m1 = f2v_pointwise(inc_norm, w1, it["mesh1"]["f2v_pw_w"],
                           it["mesh1"]["f2v_pw_shift"])                # (Nv, C1p)
        w2 = v2f_stage(m1, face, coeff, it["mesh2"])                   # (Nf, C1p)
        # ---- point branch -----------------------------------------------------
        p1 = linear_act(x, it["dense"]["w"], it["dense"]["shift"])     # (Nv, C1p)
        # ---- fused tail: mesh2 F2V + spherical depthwise reductions, pointwise,
        #      passthrough embedding, concat-as-sum, single lane-dense store ------
        t = it["tail"]
        x = dual_tail(x, t["ex"], inc_norm, w2, t["wm"], t["sm"],
                      adj, p1, it["pcloud"]["dw"], t["wp"], t["sp"])   # (Nv, c_out_pad)
    out = linear_act(x, params["transit"]["w"], params["transit"]["shift"],
                     apply_relu=True, out_dtype=jnp.float32)
    return out[:, :params["out_channels"]]                             # strip lane pad


# ----------------------------------------------------------------------------
if __name__ == "__main__":
    NV, NF = 64, 96
    IN_CH, OUT_CH, GROWTH, MESH_K = 16, 32, 8, 9
    RADIUS, MAX_ITER, MAX_NN = 0.35, 2, 16

    key = jax.random.PRNGKey(0)
    kparam, kvert, kfeat, kface, kcoeff = jax.random.split(key, 5)

    params = init_dualblock_params(kparam, IN_CH, OUT_CH, GROWTH, MESH_K, MAX_ITER)

    vertex = jax.random.uniform(kvert, (NV, 3), jnp.float32)
    inputs = jax.random.normal(kfeat, (NV, IN_CH), jnp.float32)
    face = jax.random.randint(kface, (NF, 3), 0, NV, dtype=jnp.int32)
    full_nf_count = jnp.sum(jax.nn.one_hot(face, NV, dtype=jnp.float32),
                            axis=(0, 1)).astype(jnp.int32)
    full_vt_map = jnp.arange(NV, dtype=jnp.int32)
    filt_coeff = jax.nn.softmax(
        jax.random.normal(kcoeff, (NF, MESH_K), jnp.float32), axis=-1)
    nv_in = jnp.array([NV], dtype=jnp.int32)

    out = dual_block_forward(params, inputs, vertex, face, full_nf_count, full_vt_map,
                             filt_coeff, nv_in,
                             radius=RADIUS, max_nn=MAX_NN, max_iter=MAX_ITER)
    out = jax.block_until_ready(out)
    assert out.shape == (NV, OUT_CH), out.shape
    assert bool(jnp.all(jnp.isfinite(out)))
    print("KERNEL_OK")
</pallas_src>

<mosaic_0001>
module attributes {stable_mosaic.version = 11 : i64} {
  func.func @_facet_weight_kernel(%arg0: i32, %arg1: memref<48x384xbf16, #tpu.memory_space<vmem>>, %arg2: memref<48x9xbf16, #tpu.memory_space<vmem>>, %arg3: memref<384x128xbf16, #tpu.memory_space<vmem>>, %arg4: memref<1x128xf32, #tpu.memory_space<vmem>>, %arg5: memref<9x128xbf16, #tpu.memory_space<vmem>>, %arg6: memref<48x128xbf16, #tpu.memory_space<vmem>>) attributes {dimension_semantics = [#tpu.dimension_semantics<parallel>], iteration_bounds = array<i64: 2>, scalar_prefetch = 0 : i64, scratch_operands = 0 : i64, tpu.core_type = #tpu.core_type<tc>, window_params = [{transform_indices = @transform_0, window_bounds = array<i64: 48, 384>}, {transform_indices = @transform_1, window_bounds = array<i64: 48, 9>}, {pipeline_mode = #tpu.pipeline_mode<synchronous>, transform_indices = @transform_2, window_bounds = array<i64: 384, 128>}, {pipeline_mode = #tpu.pipeline_mode<synchronous>, transform_indices = @transform_3, window_bounds = array<i64: 1, 128>}, {pipeline_mode = #tpu.pipeline_mode<synchronous>, transform_indices = @transform_4, window_bounds = array<i64: 9, 128>}, {transform_indices = @transform_5, window_bounds = array<i64: 48, 128>}]} {
    %c0 = arith.constant 0 : index
    %c0_0 = arith.constant 0 : index
    %0 = vector.load %arg1[%c0, %c0_0] : memref<48x384xbf16, #tpu.memory_space<vmem>>, vector<48x384xbf16>
    %c0_1 = arith.constant 0 : index
    %c0_2 = arith.constant 0 : index
    %1 = vector.load %arg3[%c0_1, %c0_2] : memref<384x128xbf16, #tpu.memory_space<vmem>>, vector<384x128xbf16>
    %cst = arith.constant dense<0.000000e+00> : vector<48x128xf32>
    %2 = tpu.matmul %0, %1, %cst {dimension_numbers = #tpu.dot_dimension_numbers<[1], [0], [0], [1], [0, 0, 1, 1], [], []>} : vector<48x384xbf16>, vector<384x128xbf16>, vector<48x128xf32> -> vector<48x128xf32>
    %c0_3 = arith.constant 0 : index
    %c0_4 = arith.constant 0 : index
    %3 = vector.load %arg4[%c0_3, %c0_4] : memref<1x128xf32, #tpu.memory_space<vmem>>, vector<1x128xf32>
    %4 = vector.broadcast %3 : vector<1x128xf32> to vector<48x128xf32>
    %5 = arith.addf %2, %4 : vector<48x128xf32>
    %cst_5 = arith.constant 0.000000e+00 : f32
    %6 = vector.broadcast %cst_5 : f32 to vector<48x128xf32>
    %7 = arith.maximumf %5, %6 : vector<48x128xf32>
    %c0_6 = arith.constant 0 : index
    %c0_7 = arith.constant 0 : index
    %8 = vector.load %arg2[%c0_6, %c0_7] : memref<48x9xbf16, #tpu.memory_space<vmem>>, vector<48x9xbf16>
    %c0_8 = arith.constant 0 : index
    %c0_9 = arith.constant 0 : index
    %9 = vector.load %arg5[%c0_8, %c0_9] : memref<9x128xbf16, #tpu.memory_space<vmem>>, vector<9x128xbf16>
    %cst_10 = arith.constant dense<0.000000e+00> : vector<48x128xf32>
    %10 = tpu.matmul %8, %9, %cst_10 {dimension_numbers = #tpu.dot_dimension_numbers<[1], [0], [0], [1], [0, 0, 1, 1], [], []>} : vector<48x9xbf16>, vector<9x128xbf16>, vector<48x128xf32> -> vector<48x128xf32>
    %11 = arith.mulf %7, %10 : vector<48x128xf32>
    %12 = arith.truncf %11 : vector<48x128xf32> to vector<48x128xbf16>
    %c0_11 = arith.constant 0 : index
    %c0_12 = arith.constant 0 : index
    %13 = vector.load %arg6[%c0_11, %c0_12] : memref<48x128xbf16, #tpu.memory_space<vmem>>, vector<48x128xbf16>
    tpu.vector_store %arg6[%c0_11, %c0_12], %12 {strides = array<i32>} : memref<48x128xbf16, #tpu.memory_space<vmem>>, vector<48x128xbf16>,
    return
  }
  func.func @transform_0(%arg0: i32) -> (i32, i32) {
    %c0_i32 = arith.constant 0 : i32
    %c0_i32_0 = arith.constant 0 : i32
    return %arg0, %c0_i32 : i32, i32
  }
  func.func @transform_1(%arg0: i32) -> (i32, i32) {
    %c0_i32 = arith.constant 0 : i32
    %c0_i32_0 = arith.constant 0 : i32
    return %arg0, %c0_i32 : i32, i32
  }
  func.func @transform_2(%arg0: i32) -> (i32, i32) {
    %c0_i32 = arith.constant 0 : i32
    %c0_i32_0 = arith.constant 0 : i32
    %c0_i32_1 = arith.constant 0 : i32
    return %c0_i32, %c0_i32_0 : i32, i32
  }
  func.func @transform_3(%arg0: i32) -> (i32, i32) {
    %c0_i32 = arith.constant 0 : i32
    %c0_i32_0 = arith.constant 0 : i32
    %c0_i32_1 = arith.constant 0 : i32
    return %c0_i32, %c0_i32_0 : i32, i32
  }
  func.func @transform_4(%arg0: i32) -> (i32, i32) {
    %c0_i32 = arith.constant 0 : i32
    %c0_i32_0 = arith.constant 0 : i32
    %c0_i32_1 = arith.constant 0 : i32
    return %c0_i32, %c0_i32_0 : i32, i32
  }
  func.func @transform_5(%arg0: i32) -> (i32, i32) {
    %c0_i32 = arith.constant 0 : i32
    %c0_i32_0 = arith.constant 0 : i32
    return %arg0, %c0_i32 : i32, i32
  }
}

</mosaic_0001>

<bundles_post_ra>
// kernel: tpu_custom_call.1
= control target key start
LH: loop header
LB: loop body
LE: loop exit
PB: predicated region body
PF: predicated region fallthrough
CT: control target
= control target key end

     0   :  { %10 = vsyncpa [#allocation3], 0  ;;  %s1606_s0 = inlined_call_operand.hbm [shape: bf16[96,384], index: 0, kind: input, shape index: {}]   ;;  %s1607_s1 = inlined_call_operand.vmem [shape: bf16[96,9], index: 1, kind: input, shape index: {}]   ;;  %s1608_s2 = inlined_call_operand.hbm [shape: bf16[384,128], index: 2, kind: input, shape index: {}]   ;;  %s1609_s3 = inlined_call_operand.vmem [shape: f32[1,128], index: 3, kind: input, shape index: {}]   ;;  %s1610_s4 = inlined_call_operand.vmem [shape: bf16[9,128], index: 4, kind: input, shape index: {}]   ;;  %s1611_s5 = inlined_call_operand.hbm [shape: bf16[96,128], index: 5, kind: output, shape index: {}]  }
   0x1   :  { %12 = vsyncpa [#allocation3 + $0x1], 0 }
   0x2   :  { %13 = vsyncpa [#allocation6], 0 }
   0x3   :  { %14 = vsyncpa [#allocation4], 0 }
   0x4   :  { %16 = vsyncpa [#allocation4 + $0x1], 0  ;;  %s1368_s18 = smov 0   ;;  %s1370_s19 = smov 0  }
   0x5   :  { %s1372_s20 = smov 0   ;;  %s1374_s21 = smov 0  }
   0x6 LB: > { %s1389_s22 = sadd.s32 4294967295, %s1324_s21   ;;  %s910_s23 = sadd.s32 4294967294, %s1324_s21   ;;  %s1324_s21 = sphi %s1374_s21, %s1631_s21   ;;  %s1320_s20 = sphi %s1372_s20, %s1630_s20   ;;  %s1316_s19 = sphi %s1370_s19, %s1629_s19   ;;  %s1312_s18 = sphi %s1368_s18, %s1628_s18  }
   0x7   : > { %p42_p0 = scmp.ne.s32.totalorder %s1316_s19, %s1312_s18  ;;  %p1612_p1 = scmp.eq.s32.totalorder %s1389_s22, 0 }
   0x8   : > { %p161_p3 = scmp.eq.s32.totalorder %s910_s23, 1  ;;  %p911_p5 = scmp.ge.s32.totalorder %s1324_s21, 1 }
   0x9   : > { %p1398_p4 = por %p1612_p1, %p42_p0  ;;  %p168_p7 = scmp.lt.s32.totalorder %s1324_s21, 3 }
   0xa   : > { %p1403_p6 = por %p161_p3, %p42_p0  ;;  %s1326_s27 = smov [#allocation5]  }
   0xb   : > { %s1615_s24 = scalar_select %p1398_p4, 1, 0 }
   0xc   : > { %s1616_s25 = scalar_select %p1403_p6, 1, 0 }
   0xd   : > { %p1408_p8 = pnand %p911_p5, %p168_p7  ;;  %s180_s28 = sshll.u32 %s1326_s27, 4  ;;  %s181_s28 = int_to_ptr.vmem [resolvable:$true] %s180_s28 }
   0xe   : > { %s1422_s30 = sadd.s32 1, %s1324_s21   ;;  %s1196_s9 = scalar_lea.hbm %s1608_s2, 3072 }
   0xf   : > { %s1617_s26 = scalar_select %p1408_p8, 1, 0 }
  0x10   : > { %p1097_p9 = pneg %p1408_p8  ;;  %s26_s6 = ssub.s32 %s1324_s21, %s1422_s30 }
  0x11   : > { %p1197_p12 = scmp.ne.s32.totalorder %s1608_s2, %s1196_s9  ;;  %p1203_p5 = scmp.lt.u32.totalorder %s1196_s9, %s1608_s2 }
  0x12   : > { %p1417_p11 = pnand %p1097_p9, %p1612_p1 }
  0x14   : > { %p1198_p13 = pneg %p1417_p11 }
  0x16   : > { %p1199_p0 = pnand %p1198_p13, %p1197_p12 }
  0x18   : > { %p1200_p3 = pneg %p1199_p0 }
  0x1a   : > { %p1205_p7 = pnand %p1203_p5, %p1200_p3 }
  0x1c   : > { %1208 = shalt.err (!%p1205_p7)
}
  0x1d   : > { %s1209_s14 = scalar_lea.vmem %s181_s28, 3072  ;;  %p1217_p2 = scmp.lt.s32.totalorder %s181_s28, %s181_s28 }
  0x1e   : > { %p1210_p9 = scmp.ne.s32.totalorder %s181_s28, %s1209_s14  ;;  %p1218_p6 = scmp.lt.s32.totalorder %s1209_s14, %s1209_s14 }
  0x20   : > { %p1212_p10 = pnand %p1210_p9, %p1198_p13  ;;  %p1219_p4 = por %p1218_p6, %p1217_p2 }
  0x22   : > { %p1213_p1 = pneg %p1212_p10 }
  0x24   : > { %p1220_p8 = pnand %p1219_p4, %p1213_p1 }
  0x26   : > { %1223 = shalt.err (!%p1220_p8)
}
  0x27   : > { %s1327_s15 = smov 64   ;;  %s1328_s16 = smov 4  }
  0x28   : > { %1100 = dma.hbm_to_vmem [thread:$0]  (!%p1417_p11), %s1608_s2, 3072, %s181_s28, [#allocation6], %s1327_s15, %s1327_s15, %s1328_s16  }
  0x29   : > { %p27_p2 = scmp.eq.s32.totalorder %s26_s6, 0  ;;  %s29_s27 = sadd.s32 1, %s1320_s20 }
  0x2a   : > { %p36_p1 = scmp.ne.s32.totalorder %s1320_s20, %s1316_s19  ;;  %p37_p4 = scmp.eq.s32.totalorder %s1324_s21, 0 }
  0x2b   : > { %s1447_s7 = scalar_select %p27_p2, %s1320_s20, %s29_s27  }
  0x2c   : > { %p38_p6 = por %p37_p4, %p36_p1  ;;  %p1619_p8 = scmp.eq.s32.totalorder %s1389_s22, 1 }
  0x2d   : > { %p1110_p12 = scmp.lt.s32.totalorder %s1324_s21, 2  ;;  %s200_s9 = sand.u32 1, %s1320_s20  }
  0x2e   : > { %p1451_p10 = por %p1619_p8, %p36_p1  ;;  %s1085_s10 = smul.u32 72, %s200_s9 }
  0x2f   : > { %s1111_s29 = smul.u32 1152, %s1324_s21  ;;  %p1458_p13 = pnand %p1110_p12, %p38_p6 }
  0x30   : > { %s204_s13 = scalar_lea.vmem [#allocation2], %s1085_s10  ;;  %s1469_s15 = scalar_lea.sflag [#allocation3], %s200_s9 }
  0x31   : > { %s1465_s12 = scalar_lea.hbm %s1606_s0, %s1111_s29  ;;  %s212_s14 = sshll.u32 %s204_s13, 4  ;;  %s1467_s14 = int_to_ptr.vmem [resolvable:$true] %s212_s14 }
  0x32   : > { %s1224_s16 = scalar_lea.hbm %s1465_s12, 1152  ;;  %p1226_p0 = pneg %p1458_p13 }
  0x33   : > { %p1225_p11 = scmp.ne.s32.totalorder %s1465_s12, %s1224_s16  ;;  %s1229_s27 = scalar_lea.hbm %s1606_s0, 2304 }
  0x34   : > { %p1230_p7 = scmp.lt.u32.totalorder %s1465_s12, %s1606_s0  ;;  %p1231_p9 = scmp.lt.u32.totalorder %s1229_s27, %s1224_s16 }
  0x35   : > { %p1227_p3 = pnand %p1226_p0, %p1225_p11  ;;  %p1233_p1 = scmp.lt.u32.totalorder %s1224_s16, %s1465_s12 }
  0x36   : > { %p1232_p2 = por %p1231_p9, %p1230_p7 }
  0x37   : > { %p1228_p5 = pneg %p1227_p3 }
  0x38   : > { %p1234_p4 = por %p1233_p1, %p1232_p2 }
  0x3a   : > { %p1235_p6 = pnand %p1234_p4, %p1228_p5 }
  0x3c   : > { %1238 = shalt.err (!%p1235_p6)
}
  0x3d   : > { %s1239_s9 = scalar_lea.vmem %s1467_s14, 1152  ;;  %s1329_s10 = smov [#allocation2]  }
  0x3e   : > { %p1240_p8 = scmp.ne.s32.totalorder %s1467_s14, %s1239_s9  ;;  %s1244_s6 = sshll.u32 %s1329_s10, 4  ;;  %s1245_s6 = int_to_ptr.vmem [resolvable:$false] %s1244_s6 }
  0x3f   : > { %s1246_s13 = scalar_lea.vmem %s1245_s6, 2304  ;;  %p1247_p3 = scmp.lt.s32.totalorder %s1467_s14, %s1245_s6 }
  0x40   : > { %p1242_p12 = pnand %p1240_p8, %p1226_p0  ;;  %p1248_p7 = scmp.lt.s32.totalorder %s1246_s13, %s1239_s9 }
  0x42   : > { %p1243_p11 = pneg %p1242_p12  ;;  %p1249_p9 = por %p1248_p7, %p1247_p3 }
  0x44   : > { %p1250_p2 = pnand %p1249_p9, %p1243_p11 }
  0x46   : > { %1253 = shalt.err (!%p1250_p2)
}
  0x47   : > { %s1330_s16 = smov 192   ;;  %s1331_s17 = smov 12  }
  0x48   : > { %1104 = dma.hbm_to_vmem [thread:$0]  (!%p1458_p13), %s1465_s12, 1152, %s1467_s14, %s1469_s15, %s1330_s16, %s1330_s16, %s1331_s17  }
  0x49   : > { %p1622_p0 = scmp.ne.s32.totalorder %s1617_s26, 0 }
  0x4a   : > { %s1500_s23 = sand.u32 (!%p1622_p0), 1, %s1316_s19   ;;  %p1623_p5 = scmp.ne.s32.totalorder (!%p1622_p0), %s1615_s24, 0 }
  0x4b   : > { %233 = sbr.rel (%p1622_p0) target bundleno = 384 (0x180), region = 40  ;;  %s236_s29 = scalar_lea.sflag (!%p1622_p0), [#allocation3], %s1500_s23 }
  0x4c   : > { %s1087_s27 = smul.u32 (!%p1622_p0), 72, %s1500_s23 }
  0x4e   : > { %s1504_s28 = scalar_lea.vmem (!%p1622_p0), [#allocation2], %s1087_s27 }
  0x52   : > { %1299 = dma.done.wait (%p1623_p5), %s236_s29, 1152  }
  0x53   : > { %1301 = vsyncadd (%p1623_p5), %s236_s29, 4294966144  ;;  %p1624_p13 = scmp.eq.s32.totalorder %s1389_s22, 0 }
  0x55   : > { %1303 = dma.done.wait (%p1624_p13), [#allocation6], 3072   ;;  %p1625_p1 = pmov %p1624_p13 }
  0x56   : > { %v1332_v0 = vmov 0.0   ;;  %vm1333_vm0 = vmmov 0   ;;  %v1156_v1 = vld [vmem:[#allocation5 + $0x40] sm:$0xff]   ;;  %v1159_v4 = vld [vmem:[#allocation5 + $0x48] sm:$0xff]   ;;  %v1162_v7 = vld [vmem:[#allocation5 + $0x50] sm:$0xff]   ;;  %s276_s24 = smul.u32 6, %s1389_s22 }
  0x57   : > { %1305 = vsyncadd (%p1625_p1), [#allocation6], 4294964224  ;;  %1041 = vmatprep.subr.bf16.mxu1 %v1332_v0  ;;  %1057 = vmatprep.mubr.msk.bf16.mxu1 %vm1333_vm0, %v1332_v0  ;;  %v1157_v2 = vld [vmem:[#allocation5 + $0x80] sm:$0xff]   ;;  %v1160_v5 = vld [vmem:[#allocation5 + $0x88] sm:$0xff]   ;;  %vm701_vm1 = vcmask 1043456   ;;  %vm702_vm2 = vcmask 1044480  }
  0x58   : > { %992 = vmatprep.subr.bf16.mxu0 %v1156_v1  ;;  %v1158_v3 = vld [vmem:[#allocation5] sm:$0xff]   ;;  %1042 = vmatpush3.bf16.msra.mxu1 %v1157_v2  ;;  %v1161_v6 = vld [vmem:[#allocation5 + $0x8] sm:$0xff]   ;;  %v1163_v8 = vld [vmem:[#allocation5 + $0x90] sm:$0xff]   ;;  %p277_p4 = scmp.lt.s32.totalorder %s276_s24, 11  ;;  %v1334_v23 = vmov 65535   ;;  %vm691_vm3 = vcmask 72704  }
  0x59   : > { %993 = vmatpush3.bf16.msra.mxu0 %v1158_v3  ;;  %1043 = vmatprep.subr.bf16.mxu1 %v1332_v0  ;;  %v1164_v9 = vld [vmem:[#allocation5 + $0x10] sm:$0xff]   ;;  %v1165_v10 = vld [vmem:[#allocation5 + $0x58] sm:$0xff]   ;;  %v1168_v13 = vld [vmem:[#allocation5 + $0x60] sm:$0xff]   ;;  %v703_v24 = vsel %vm701_vm1, 4294967295, %v1334_v23  ;;  %s1088_s13 = smul.u32 24, %s1500_s23  ;;  %s802_s26 = scalar_lea.sflag [#allocation4], %s1500_s23 }
  0x5a   : > { %994 = vmatprep.subr.bf16.mxu0 %v1159_v4  ;;  %v1166_v11 = vld [vmem:[#allocation5 + $0x98] sm:$0xff]   ;;  %v1169_v14 = vld [vmem:[#allocation5 + $0xa0] sm:$0xff]   ;;  %v1171_v16 = vld [vmem:[#allocation5 + $0x68] sm:$0xff]   ;;  %s1633_s24 = smov (!%p277_p4, %s276_s24), 11  ;;  %v704_v28 = vsel %vm702_vm2, %v703_v24, 0  ;;  %s974_s27 = smul.u32 384, %s1389_s22 }
  0x5b   : > { %v1167_v12 = vld [vmem:[#allocation5 + $0x18] sm:$0xff]   ;;  %v1170_v15 = vld [vmem:[#allocation5 + $0x20] sm:$0xff]   ;;  %v1172_v17 = vld [vmem:[#allocation5 + $0xa8] sm:$0xff]   ;;  %s917_s12 = sshll.u32 %s1633_s24, 2  ;;  %s274_s16 = scalar_lea.vmem [#allocation7], %s1088_s13 }
  0x5c   : > { %1044 = vmatpush3.bf16.msra.mxu1 %v1160_v5  ;;  %v1173_v18 = vld [vmem:[#allocation5 + $0x28] sm:$0xff]   ;;  %v1174_v19 = vld [vmem:[#allocation5 + $0x70] sm:$0xff]   ;;  %v1177_v22 = vld [vmem:[#allocation5 + $0x78] sm:$0xff]   ;;  %s280_s9 = scalar_lea.vmem %s1607_s1, %s917_s12  ;;  %s815_s17 = sshll.u32 %s274_s16, 4  ;;  %s1557_s17 = int_to_ptr.vmem [resolvable:$true] %s815_s17 }
  0x5d   : > { %995 = vmatpush3.bf16.msra.mxu0 %v1161_v6  ;;  %1045 = vmatprep.subr.bf16.mxu1 %v1332_v0  ;;  %v1175_v20 = vld [vmem:[#allocation5 + $0xb0] sm:$0xff]   ;;  %v1178_v26 = vld [vmem:[#allocation5 + $0xb8] sm:$0xff]   ;;  %v1195_v41 = vld [vmem:[%s280_s9 + $0x10] sm:$0xff]   ;;  %s1562_s24 = scalar_lea.hbm %s1611_s5, %s974_s27  ;;  %s1254_s22 = scalar_lea.vmem %s1557_s17, 384 }
  0x5e   : > { %996 = vmatprep.subr.bf16.mxu0 %v1162_v7  ;;  %v1176_v21 = vld [vmem:[#allocation5 + $0x30] sm:$0xff]   ;;  %v1179_v29 = vld [vmem:[#allocation5 + $0x38] sm:$0xff]   ;;  %p1255_p6 = scmp.ne.s32.totalorder %s1557_s17, %s1254_s22  ;;  %s1335_s11 = smov [#allocation7]  }
  0x5f   : > { %v1182_v25 = vld [vmem:[%s1504_s28 + $0x4] ss:$12 sps:$4 sm:$0xff]   ;;  %v1183_v30 = vld [vmem:[%s1504_s28 + $0x8] ss:$12 sps:$4 sm:$0xff]   ;;  %v1180_v31 = vld [vmem:[%s1504_s28] ss:$12 sps:$4 sm:$0xff]  }
  0x60   : > { %1046 = vmatpush3.bf16.msra.mxu1 %v1163_v8  ;;  %575 = vmatprep.mubr.bf16.mxu0 %v1182_v25  ;;  %v1184_v27 = vld [vmem:[%s1610_s4] sm:$0x1f]   ;;  %v1193_v39 = vld [vmem:[%s280_s9 + $0x8] sm:$0xff]   ;;  %p1256_p8 = pnand %p1255_p6, %p1451_p10  ;;  %s1258_s12 = sshll.u32 %s1335_s11, 4  ;;  %s1259_s12 = int_to_ptr.vmem [resolvable:$false] %s1258_s12 }
  0x61   : > { %997 = vmatpush3.bf16.msra.mxu0 %v1164_v9  ;;  %1047 = vmatprep.subr.bf16.mxu1 %v1332_v0  ;;  %v706_v32 = vand.u32 %v1184_v27, %v704_v28  ;;  %v1185_v33 = vld [vmem:[%s1504_s28 + $0x1c] ss:$12 sps:$4 sm:$0xff]   ;;  %v1187_v34 = vld [vmem:[%s1504_s28 + $0x20] ss:$12 sps:$4 sm:$0xff]   ;;  %v1188_v35 = vld [vmem:[%s1504_s28 + $0x18] ss:$12 sps:$4 sm:$0xff]   ;;  %p1261_p11 = scmp.lt.s32.totalorder %s1557_s17, %s1259_s12 }
  0x62   : > { %998 = vmatprep.subr.bf16.mxu0 %v1165_v10  ;;  %v1189_v36 = vld [vmem:[%s1504_s28 + $0x34] ss:$12 sps:$4 sm:$0xff]   ;;  %v1191_v37 = vld [vmem:[%s1504_s28 + $0x38] ss:$12 sps:$4 sm:$0xff]   ;;  %v1192_v38 = vld [vmem:[%s1504_s28 + $0x30] ss:$12 sps:$4 sm:$0xff]   ;;  %p1257_p12 = pneg %p1256_p8 }
  0x63   : > { %v1194_v40 = vld [vmem:[%s280_s9] sm:$0xff]   ;;  %s1260_s14 = scalar_lea.vmem %s1259_s12, 768 }
  0x64   : > { %1048 = vmatpush3.bf16.msra.mxu1 %v1166_v11  ;;  %v918_v45 = vld [vmem:[%s1609_s3] ss:$0 sm:$0xff]  ;;  %p1262_p3 = scmp.lt.s32.totalorder %s1260_s14, %s1254_s22 }
  0x65   : > { %999 = vmatpush3.bf16.msra.mxu0 %v1167_v12  ;;  %1049 = vmatprep.subr.bf16.mxu1 %v1332_v0 }
  0x66   : > { %1000 = vmatprep.subr.bf16.mxu0 %v1168_v13  ;;  %p1263_p7 = por %p1262_p3, %p1261_p11 }
  0x68   : > { %1050 = vmatpush3.bf16.msra.mxu1 %v1169_v14  ;;  %p1264_p9 = pnand %p1263_p7, %p1257_p12 }
  0x69   : > { %1001 = vmatpush3.bf16.msra.mxu0 %v1170_v15  ;;  %1051 = vmatprep.subr.bf16.mxu1 %v1332_v0 }
  0x6a   : > { %1002 = vmatprep.subr.bf16.mxu0 %v1171_v16 }
  0x6c   : > { %1052 = vmatpush3.bf16.msra.mxu1 %v1172_v17 }
  0x6d   : > { %1003 = vmatpush3.bf16.msra.mxu0 %v1173_v18  ;;  %1053 = vmatprep.subr.bf16.mxu1 %v1332_v0 }
  0x6e   : > { %1004 = vmatprep.subr.bf16.mxu0 %v1174_v19 }
  0x70   : > { %1054 = vmatpush3.bf16.msra.mxu1 %v1175_v20 }
  0x71   : > { %1005 = vmatpush3.bf16.msra.mxu0 %v1176_v21  ;;  %1055 = vmatprep.subr.bf16.mxu1 %v1332_v0 }
  0x72   : > { %1006 = vmatprep.subr.bf16.mxu0 %v1177_v22 }
  0x74   : > { %1056 = vmatpush3.bf16.msra.mxu1 %v1178_v26 }
  0x75   : > { %1007 = vmatpush3.bf16.msra.mxu0 %v1179_v29  ;;  %1083 = vmatprep.subr.bf16.mxu1 %v1332_v0 }
  0x76   : > { %1069 = vmatprep.subr.bf16.mxu0 %v1332_v0 }
  0x77   : > { %1058 = vmatmul.mubr.bf16.vlgmr.msra.gmra.mrb[0].mxu1 %v1183_v30 }
  0x78   : > { %576 = vmatmul.mubr.bf16.vlgmr.msra.gmra.mrb[0].mxu0 %v1180_v31  ;;  %1084 = vmatpush3.bf16.msra.mxu1 %v706_v32 }
  0x79   : > { %1061 = vmatprep.mubr.msk.bf16.mxu1 %vm1333_vm0, %v1332_v0  ;;  %583 = vmatprep.mubr.bf16.mxu0 %v1185_v33 }
  0x7a   : > { %1070 = vmatpush3.bf16.msra.mxu0 %v706_v32 }
  0x7f   : > { %1062 = vmatmul.mubr.bf16.gmra.mrb[4].mxu1 %v1187_v34 }
  0x80   : > { %584 = vmatmul.mubr.bf16.gmra.mrb[4].mxu0 %v1188_v35  ;;  %1065 = vmatprep.mubr.msk.bf16.mxu1 %vm1333_vm0, %v1332_v0 }
  0x81   : > { %591 = vmatprep.mubr.bf16.mxu0 %v1189_v36 }
  0x87   : > { %1066 = vmatmul.mubr.bf16.gmra.mrb[8].mxu1 %v1191_v37 }
  0x88   : > { %592 = vmatmul.mubr.bf16.gmra.mrb[8].mxu0 %v1192_v38  ;;  %1075 = vmatprep.mubr.msk.bf16.mxu1 %vm1333_vm0, %v1332_v0 }
  0x89   : > { %1071 = vmatprep.mubr.msk.bf16.mxu0 %vm1333_vm0, %v1332_v0 }
  0x8f   : > { %1076 = vmatmul.mubr.msk.bf16.vlgmr.msra.gmra.mrb[12].mxu1 %vm691_vm3, %v1193_v39 }
  0x90   : > { %1072 = vmatmul.mubr.msk.bf16.vlgmr.msra.gmra.mrb[12].mxu0 %vm691_vm3, %v1194_v40  ;;  %1079 = vmatprep.mubr.msk.bf16.mxu1 %vm1333_vm0, %v1332_v0 }
  0x97   : > { %1080 = vmatmul.mubr.msk.bf16.gmra.mrb[16].mxu1 %vm691_vm3, %v1195_v41 }
 0x14a   : > { %v634_v42 = vpop.f32.mrb[0].mxu1 }
 0x14b   : > { %v1008_v43 = vpop.f32.mrb[0].mxu0  ;;  %v1059_v44 = vpop.f32.mrb[1].mxu1 }
 0x14c   : > { %v1009_v46 = vpop.f32.mrb[1].mxu0  ;;  %v637_v47 = vpop.f32.mrb[2].mxu1 }
 0x14d   : > { %v1010_v48 = vadd.f32 %v1009_v46, %v1008_v43  ;;  %v1011_v49 = vpop.f32.mrb[2].mxu0  ;;  %v1060_v50 = vpop.f32.mrb[3].mxu1 }
 0x14e   : > { %v1012_v51 = vpop.f32.mrb[3].mxu0 }
 0x14f   : > { %v578_v52 = vadd.f32 %v1010_v48, %v918_v45  ;;  %v1013_v53 = vadd.f32 %v1012_v51, %v1011_v49 }
 0x151   : > { %v581_v54 = vadd.f32 %v1013_v53, %v918_v45  ;;  %v635_v55 = vadd.f32 %v634_v42, %v578_v52 }
 0x152   : > { %v642_v56 = vpop.f32.mrb[4].mxu1 }
 0x153   : > { %v1014_v57 = vpop.f32.mrb[4].mxu0  ;;  %v1063_v58 = vpop.f32.mrb[5].mxu1  ;;  %v638_v59 = vadd.f32 %v637_v47, %v581_v54  ;;  %v657_v22 = vmax.f32 %v635_v55, 0.0 }
 0x154   : > { %v1015_v60 = vpop.f32.mrb[5].mxu0  ;;  %v645_v61 = vpop.f32.mrb[6].mxu1 }
 0x155   : > { %v1016_v62 = vadd.f32 %v1015_v60, %v1014_v57  ;;  %v1017_v63 = vpop.f32.mrb[6].mxu0  ;;  %v1064_v0 = vpop.f32.mrb[7].mxu1  ;;  %v658_v31 = vmax.f32 %v638_v59, 0.0 }
 0x156   : > { %v1018_v1 = vpop.f32.mrb[7].mxu0 }
 0x157   : > { %v586_v2 = vadd.f32 %v1016_v62, %v918_v45  ;;  %v1019_v3 = vadd.f32 %v1018_v1, %v1017_v63 }
 0x159   : > { %v589_v4 = vadd.f32 %v1019_v3, %v918_v45  ;;  %v643_v5 = vadd.f32 %v642_v56, %v586_v2 }
 0x15a   : > { %v650_v6 = vpop.f32.mrb[8].mxu1 }
 0x15b   : > { %v1020_v7 = vpop.f32.mrb[8].mxu0  ;;  %v1067_v8 = vpop.f32.mrb[9].mxu1  ;;  %v646_v9 = vadd.f32 %v645_v61, %v589_v4  ;;  %v659_v19 = vmax.f32 %v643_v5, 0.0 }
 0x15c   : > { %v1021_v10 = vpop.f32.mrb[9].mxu0  ;;  %v653_v11 = vpop.f32.mrb[10].mxu1 }
 0x15d   : > { %v1022_v12 = vadd.f32 %v1021_v10, %v1020_v7  ;;  %v1023_v13 = vpop.f32.mrb[10].mxu0  ;;  %v1068_v14 = vpop.f32.mrb[11].mxu1  ;;  %v660_v26 = vmax.f32 %v646_v9, 0.0 }
 0x15e   : > { %v1024_v15 = vpop.f32.mrb[11].mxu0 }
 0x15f   : > { %v594_v16 = vadd.f32 %v1022_v12, %v918_v45  ;;  %v1025_v17 = vadd.f32 %v1024_v15, %v1023_v13 }
 0x161   : > { %v597_v18 = vadd.f32 %v1025_v17, %v918_v45  ;;  %v651_v20 = vadd.f32 %v650_v6, %v594_v16 }
 0x162   : > { %v750_v21 = vpop.f32.mrb[12].mxu1 }
 0x163   : > { %v767_v23 = vmul.f32 %v750_v21, %v659_v19  ;;  %v742_v24 = vpop.f32.mrb[12].mxu0  ;;  %v1077_v25 = vpop.f32.mrb[13].mxu1  ;;  %v654_v27 = vadd.f32 %v653_v11, %v597_v18  ;;  %v661_v39 = vmax.f32 %v651_v20, 0.0 }
 0x164   : > { %v765_v28 = vmul.f32 %v742_v24, %v657_v22  ;;  %v1073_v29 = vpop.f32.mrb[13].mxu0  ;;  %v753_v30 = vpop.f32.mrb[14].mxu1 }
 0x165   : > { %v768_v32 = vmul.f32 %v753_v30, %v660_v26  ;;  %v745_v33 = vpop.f32.mrb[14].mxu0  ;;  %v1078_v34 = vpop.f32.mrb[15].mxu1  ;;  %v662_v43 = vmax.f32 %v654_v27, 0.0 }
 0x166   : > { %v766_v35 = vmul.f32 %v745_v33, %v658_v31  ;;  %v1074_v36 = vpop.f32.mrb[15].mxu0 }
 0x167   : > { %v983_v37 = vpack.c.bf16 %v768_v32, %v767_v23 }
 0x168   : > { %v978_v38 = vpack.c.bf16 %v766_v35, %v765_v28 }
 0x169   : > { %990 = vst [vmem:[%s274_s16 + $0x8] sm:$0xff] %v983_v37  }
 0x16a   : > { %979 = vst [vmem:[%s274_s16] sm:$0xff] %v978_v38   ;;  %v758_v40 = vpop.f32.mrb[16].mxu1 }
 0x16b   : > { %v769_v41 = vmul.f32 %v758_v40, %v661_v39  ;;  %v1081_v42 = vpop.f32.mrb[17].mxu1 }
 0x16c   : > { %v761_v44 = vpop.f32.mrb[18].mxu1 }
 0x16d   : > { %v770_v45 = vmul.f32 %v761_v44, %v662_v43  ;;  %v1082_v46 = vpop.f32.mrb[19].mxu1 }
 0x16f   : > { %v988_v47 = vpack.c.bf16 %v770_v45, %v769_v41 }
 0x171   : > { %991 = vst [vmem:[%s274_s16 + $0x10] sm:$0xff] %v988_v47  }
 0x172   : > { %1267 = shalt.err (!%p1264_p9)
}
 0x173   : > { %s1268_s15 = scalar_lea.hbm %s1562_s24, 384  ;;  %s1272_s6 = scalar_lea.hbm %s1611_s5, 768 }
 0x174   : > { %p1269_p2 = scmp.ne.s32.totalorder %s1562_s24, %s1268_s15  ;;  %p1273_p13 = scmp.lt.u32.totalorder %s1562_s24, %s1611_s5 }
 0x175   : > { %p1274_p1 = scmp.lt.u32.totalorder %s1272_s6, %s1268_s15  ;;  %p1276_p6 = scmp.lt.u32.totalorder %s1268_s15, %s1562_s24 }
 0x176   : > { %p1270_p0 = pnand %p1269_p2, %p1451_p10 }
 0x177   : > { %p1275_p4 = por %p1274_p1, %p1273_p13 }
 0x178   : > { %p1271_p5 = pneg %p1270_p0 }
 0x179   : > { %p1277_p8 = por %p1276_p6, %p1275_p4 }
 0x17b   : > { %p1278_p12 = pnand %p1277_p8, %p1271_p5 }
 0x17d   : > { %1281 = shalt.err (!%p1278_p12)
}
 0x17e   : > { %s1336_s27 = smov 64   ;;  %s1337_s29 = smov 4  }
 0x17f   : > { %1095 = dma.vmem_to_hbm [thread:$0]  (%p1451_p10), %s1557_s17, 384, %s1562_s24, %s802_s26, %s1336_s27, %s1336_s27, %s1337_s29  }
 0x180 PF: > { %s830_s28 = sand.u32 1, %s1312_s18   ;;  %p1626_p11 = scmp.ne.s32.totalorder %s1616_s25, 0 }
 0x181   : > { %p1627_p3 = scmp.ge.s32.totalorder %s1324_s21, 2  ;;  %s831_s22 = scalar_lea.sflag [#allocation4], %s830_s28 }
 0x183   : > { %p1106_p7 = pnand %p1627_p3, %p1626_p11 }
 0x185   : > { %1307 = dma.done.wait (!%p1106_p7), %s831_s22, 384  }
 0x186   : > { %1309 = vsyncadd (!%p1106_p7), %s831_s22, 4294966912  ;;  %p19_p9 = scmp.ge.s32.totalorder %s1422_s30, 4   ;;  %s1628_s18 = smov %s1316_s19 }
 0x187   : > { %s1629_s19 = smov %s1320_s20  ;;  %s1630_s20 = smov %s1447_s7 }
 0x188   : > { %s1631_s21 = smov %s1422_s30  ;;  %21 = sbr.rel (!%p19_p9) target bundleno = 6 (0x6), region = 92 }
 0x18f   :  { %836 = vsyncpa [#allocation3], 1 }
 0x190   :  { %838 = vsyncpa [#allocation3 + $0x1], 1 }
 0x191   :  { %839 = vsyncpa [#allocation6], 1 }
 0x192   :  { %840 = vsyncpa [#allocation4], 1 }
 0x193   :  { %842 = vsyncpa [#allocation4 + $0x1], 1 }

</bundles_post_ra>
